<compile_context>
chip_gen: v7x
topology: tpu7x:2x2x1
jax: 0.10.0
libtpu: 0.0.40
codegen_flags: <defaults>
</compile_context>

<pallas_src>
from functools import partial

import jax
import jax.numpy as jnp
from jax.experimental import pallas as pl
from jax.experimental.pallas import tpu as pltpu


def _round_up(x: int, m: int) -> int:
    return (x + m - 1) // m * m


def _mlp_kernel(h0p, h1p, out_dim, x_ref, w0_ref, w1_ref, w2_ref, b_ref, o_ref):
    """One batch tile: three MXU matmuls + f32 bias/ReLU/sigmoid epilogue.

    x_ref  : (block_b, in_dim)        f32 (cast to matmul dtype in-kernel)
    w0_ref : (in_dim, h0p)            matmul dtype
    w1_ref : (h0p, h1p)               matmul dtype
    w2_ref : (h1p, out_dim)           matmul dtype
    b_ref  : (1, h0p + h1p + out_dim) f32, concatenated biases
    o_ref  : (block_b, out_dim)       f32
    """
    mm_dtype = w0_ref.dtype
    x = x_ref[...].astype(mm_dtype)

    # Layer 0
    h0 = jnp.dot(x, w0_ref[...], preferred_element_type=jnp.float32)
    h0 = jnp.maximum(h0 + b_ref[:, 0:h0p], 0.0)

    # Layer 1
    h1 = jnp.dot(h0.astype(mm_dtype), w1_ref[...],
                 preferred_element_type=jnp.float32)
    h1 = jnp.maximum(h1 + b_ref[:, h0p:h0p + h1p], 0.0)

    # Output layer + sigmoid
    y = jnp.dot(h1.astype(mm_dtype), w2_ref[...],
                preferred_element_type=jnp.float32)
    y = y + b_ref[:, h0p + h1p:h0p + h1p + out_dim]
    o_ref[...] = jax.nn.sigmoid(y).astype(o_ref.dtype)


def prepare_params(w0, b0, w1, b1, w2, b2, matmul_dtype=jnp.bfloat16):
    """One-time parameter packing (hoisted out of the per-call path).

    PyTorch-convention weights wi: (out_i, in_i), biases bi: (out_i,).
    Returns weights transposed to (in, out) and cast to `matmul_dtype`.
    Hidden dims are zero-padded to multiples of 128 (lane alignment for the
    intermediate activations and aligned bias slices); the first layer's K
    stays at the raw in_dim (it must match the unpadded x) and the output
    layer's N stays at the raw out_dim (lane-exact output store, no slicing).
    """
    in_dim, h0 = w0.shape[1], w0.shape[0]
    h1, out_dim = w1.shape[0], w2.shape[0]
    h0p = _round_up(h0, 128)
    h1p = _round_up(h1, 128)

    def pad_wT(w, k_pad, n_pad):
        wt = jnp.asarray(w, jnp.float32).T  # (k, n)
        wt = jnp.pad(wt, ((0, k_pad - wt.shape[0]), (0, n_pad - wt.shape[1])))
        return wt.astype(matmul_dtype)

    w0t = pad_wT(w0, in_dim, h0p)     # (in_dim, h0p)
    w1t = pad_wT(w1, h0p, h1p)        # (h0p, h1p)
    w2t = pad_wT(w2, h1p, out_dim)    # (h1p, out_dim)

    bcat = jnp.concatenate([
        jnp.pad(jnp.asarray(b0, jnp.float32), (0, h0p - h0)),
        jnp.pad(jnp.asarray(b1, jnp.float32), (0, h1p - h1)),
        jnp.asarray(b2, jnp.float32),
    ]).reshape(1, h0p + h1p + out_dim)

    dims = dict(in_dim=in_dim, out_dim=out_dim, h0=h0, h1=h1, h0p=h0p, h1p=h1p)
    return (w0t, w1t, w2t, bcat), dims


def top_layer_model_forward(x, packed_params, dims, *, block_b=None):
    """x: (B, in_dim) f32 -> (B, out_dim) f32."""
    w0t, w1t, w2t, bcat = packed_params
    B, in_dim = x.shape
    assert in_dim == dims["in_dim"]
    h0p, h1p, out_dim = dims["h0p"], dims["h1p"], dims["out_dim"]
    itm = jnp.dtype(w0t.dtype).itemsize
    itx = jnp.dtype(x.dtype).itemsize

    # --- VMEM footprint per batch row (double-buffered x/out tiles, in-kernel
    # f32 intermediates + their matmul-dtype casts) and resident weights. ---
    per_row = (2 * in_dim * itx + in_dim * itm
               + (h0p + h1p) * (4 + itm)
               + 3 * out_dim * 4)
    weight_bytes = ((in_dim * h0p + h0p * h1p + h1p * out_dim) * itm
                    + 8 * (h0p + h1p + out_dim) * 4)
    budget = 10 * 1024 * 1024  # keep footprint well under every scoped-VMEM default
    max_rows = max(8, ((budget - 2 * weight_bytes) // per_row) // 8 * 8)

    # --- batch tile: big (amortize ~0.35us/step), but >=2 grid steps for
    # moderate B so v7x's two TensorCores both get work on the parallel axis.
    if block_b is None:
        if B > 16:
            block_b = min(4096, _round_up(pl.cdiv(B, 2), 8))
        else:
            block_b = _round_up(max(B, 8), 8)
    block_b = min(max(8, _round_up(block_b, 8)), max_rows)
    grid = (pl.cdiv(B, block_b),)

    footprint = block_b * per_row + 2 * weight_bytes
    vmem_limit = int(min(max(2 * footprint, 4 * 1024 * 1024), 32 * 1024 * 1024))

    cost = pl.CostEstimate(
        flops=2 * B * (in_dim * h0p + h0p * h1p + h1p * out_dim),
        transcendentals=B * out_dim,
        bytes_accessed=(B * in_dim * itx
                        + (w0t.size + w1t.size + w2t.size) * itm
                        + bcat.size * 4
                        + B * out_dim * 4),
    )

    kernel = partial(_mlp_kernel, h0p, h1p, out_dim)

    return pl.pallas_call(
        kernel,
        out_shape=jax.ShapeDtypeStruct((B, out_dim), jnp.float32),
        grid_spec=pltpu.PrefetchScalarGridSpec(
            num_scalar_prefetch=0,
            grid=grid,
            in_specs=[
                pl.BlockSpec((block_b, in_dim), lambda i: (i, 0)),            # raw x tile
                pl.BlockSpec((in_dim, h0p), lambda i: (0, 0)),                # W0^T
                pl.BlockSpec((h0p, h1p), lambda i: (0, 0)),                   # W1^T
                pl.BlockSpec((h1p, out_dim), lambda i: (0, 0)),               # W2^T
                pl.BlockSpec((1, h0p + h1p + out_dim), lambda i: (0, 0)),     # biases
            ],
            out_specs=pl.BlockSpec((block_b, out_dim), lambda i: (i, 0)),
        ),
        compiler_params=pltpu.CompilerParams(
            dimension_semantics=("parallel",),
            vmem_limit_bytes=vmem_limit,
        ),
        cost_estimate=cost,
    )(x, w0t, w1t, w2t, bcat)


def _init_linear(key, out_dim, in_dim):
    # Mimics torch.nn.Linear's uniform(-1/sqrt(in), 1/sqrt(in)) init.
    kw, kb = jax.random.split(key)
    bound = 1.0 / jnp.sqrt(jnp.float32(in_dim))
    w = jax.random.uniform(kw, (out_dim, in_dim), jnp.float32, -bound, bound)
    b = jax.random.uniform(kb, (out_dim,), jnp.float32, -bound, bound)
    return w, b


def _reference_forward(x, w0, b0, w1, b1, w2, b2):
    h = jnp.maximum(x @ w0.T + b0, 0.0)
    h = jnp.maximum(h @ w1.T + b1, 0.0)
    return jax.nn.sigmoid(h @ w2.T + b2)


if __name__ == "__main__":
    # Small shapes consistent with TopLayerModel: in -> hidden0 -> hidden1 -> out
    batch = 8
    in_dim, hidden0, hidden1, out_dim = 32, 64, 64, 16

    key = jax.random.PRNGKey(0)
    kx, k0, k1, k2, kx2 = jax.random.split(key, 5)

    x = jax.random.normal(kx, (batch, in_dim), jnp.float32)
    w0, b0 = _init_linear(k0, hidden0, in_dim)
    w1, b1 = _init_linear(k1, hidden1, hidden0)
    w2, b2 = _init_linear(k2, out_dim, hidden1)

    ref = _reference_forward(x, w0, b0, w1, b1, w2, b2)

    # f32 matmul path: strict check.
    params_f32, dims = prepare_params(w0, b0, w1, b1, w2, b2,
                                      matmul_dtype=jnp.float32)
    out_f32 = jax.block_until_ready(top_layer_model_forward(x, params_f32, dims))
    assert out_f32.shape == (batch, out_dim)
    assert jnp.allclose(out_f32, ref, atol=1e-5, rtol=1e-5)

    # bf16 matmul path (MXU-friendly default): loose check vs f32 reference.
    params_bf16, dims_b = prepare_params(w0, b0, w1, b1, w2, b2,
                                         matmul_dtype=jnp.bfloat16)
    out_bf16 = jax.block_until_ready(top_layer_model_forward(x, params_bf16, dims_b))
    assert out_bf16.shape == (batch, out_dim)
    assert jnp.allclose(out_bf16, ref, atol=2e-2, rtol=2e-2)

    # Ragged batch, auto tile: 2-step grid with a partial (masked) last block.
    x2 = jax.random.normal(kx2, (40, in_dim), jnp.float32)
    ref2 = _reference_forward(x2, w0, b0, w1, b1, w2, b2)
    out2 = jax.block_until_ready(top_layer_model_forward(x2, params_bf16, dims_b))
    assert out2.shape == (40, out_dim)
    assert jnp.allclose(out2, ref2, atol=2e-2, rtol=2e-2)

    # Explicit small tile: 3-step grid, partial last block, strict f32 check.
    out2b = jax.block_until_ready(
        top_layer_model_forward(x2, params_f32, dims, block_b=16))
    assert out2b.shape == (40, out_dim)
    assert jnp.allclose(out2b, ref2, atol=1e-5, rtol=1e-5)

    print("KERNEL_OK")
</pallas_src>

<mosaic_0001>
module attributes {stable_mosaic.version = 11 : i64} {
  func.func @_mlp_kernel(%arg0: i32, %arg1: memref<8x32xf32, #tpu.memory_space<vmem>>, %arg2: memref<32x128xf32, #tpu.memory_space<vmem>>, %arg3: memref<128x128xf32, #tpu.memory_space<vmem>>, %arg4: memref<128x16xf32, #tpu.memory_space<vmem>>, %arg5: memref<1x272xf32, #tpu.memory_space<vmem>>, %arg6: memref<8x16xf32, #tpu.memory_space<vmem>>) attributes {dimension_semantics = [#tpu.dimension_semantics<parallel>], iteration_bounds = array<i64: 1>, scalar_prefetch = 0 : i64, scratch_operands = 0 : i64, tpu.core_type = #tpu.core_type<tc>, window_params = [{transform_indices = @transform_0, window_bounds = array<i64: 8, 32>}, {pipeline_mode = #tpu.pipeline_mode<synchronous>, transform_indices = @transform_1, window_bounds = array<i64: 32, 128>}, {pipeline_mode = #tpu.pipeline_mode<synchronous>, transform_indices = @transform_2, window_bounds = array<i64: 128, 128>}, {pipeline_mode = #tpu.pipeline_mode<synchronous>, transform_indices = @transform_3, window_bounds = array<i64: 128, 16>}, {pipeline_mode = #tpu.pipeline_mode<synchronous>, transform_indices = @transform_4, window_bounds = array<i64: 1, 272>}, {transform_indices = @transform_5, window_bounds = array<i64: 8, 16>}]} {
    %c0 = arith.constant 0 : index
    %c0_0 = arith.constant 0 : index
    %0 = vector.load %arg1[%c0, %c0_0] : memref<8x32xf32, #tpu.memory_space<vmem>>, vector<8x32xf32>
    %c0_1 = arith.constant 0 : index
    %c0_2 = arith.constant 0 : index
    %1 = vector.load %arg2[%c0_1, %c0_2] : memref<32x128xf32, #tpu.memory_space<vmem>>, vector<32x128xf32>
    %cst = arith.constant dense<0.000000e+00> : vector<8x128xf32>
    %2 = tpu.matmul %0, %1, %cst {dimension_numbers = #tpu.dot_dimension_numbers<[1], [0], [0], [1], [0, 0, 1, 1], [], []>} : vector<8x32xf32>, vector<32x128xf32>, vector<8x128xf32> -> vector<8x128xf32>
    %c0_3 = arith.constant 0 : index
    %c0_4 = arith.constant 0 : index
    %3 = vector.load %arg5[%c0_3, %c0_4] : memref<1x272xf32, #tpu.memory_space<vmem>>, vector<1x128xf32>
    %4 = vector.broadcast %3 : vector<1x128xf32> to vector<8x128xf32>
    %5 = arith.addf %2, %4 : vector<8x128xf32>
    %cst_5 = arith.constant 0.000000e+00 : f32
    %6 = vector.broadcast %cst_5 : f32 to vector<8x128xf32>
    %7 = arith.maximumf %5, %6 : vector<8x128xf32>
    %c0_6 = arith.constant 0 : index
    %c0_7 = arith.constant 0 : index
    %8 = vector.load %arg3[%c0_6, %c0_7] : memref<128x128xf32, #tpu.memory_space<vmem>>, vector<128x128xf32>
    %cst_8 = arith.constant dense<0.000000e+00> : vector<8x128xf32>
    %9 = tpu.matmul %7, %8, %cst_8 {dimension_numbers = #tpu.dot_dimension_numbers<[1], [0], [0], [1], [0, 0, 1, 1], [], []>} : vector<8x128xf32>, vector<128x128xf32>, vector<8x128xf32> -> vector<8x128xf32>
    %c0_9 = arith.constant 0 : index
    %c128 = arith.constant 128 : index
    %10 = vector.load %arg5[%c0_9, %c128] : memref<1x272xf32, #tpu.memory_space<vmem>>, vector<1x128xf32>
    %11 = vector.broadcast %10 : vector<1x128xf32> to vector<8x128xf32>
    %12 = arith.addf %9, %11 : vector<8x128xf32>
    %cst_10 = arith.constant 0.000000e+00 : f32
    %13 = vector.broadcast %cst_10 : f32 to vector<8x128xf32>
    %14 = arith.maximumf %12, %13 : vector<8x128xf32>
    %c0_11 = arith.constant 0 : index
    %c0_12 = arith.constant 0 : index
    %15 = vector.load %arg4[%c0_11, %c0_12] : memref<128x16xf32, #tpu.memory_space<vmem>>, vector<128x16xf32>
    %cst_13 = arith.constant dense<0.000000e+00> : vector<8x16xf32>
    %16 = tpu.matmul %14, %15, %cst_13 {dimension_numbers = #tpu.dot_dimension_numbers<[1], [0], [0], [1], [0, 0, 1, 1], [], []>} : vector<8x128xf32>, vector<128x16xf32>, vector<8x16xf32> -> vector<8x16xf32>
    %c0_14 = arith.constant 0 : index
    %c256 = arith.constant 256 : index
    %17 = vector.load %arg5[%c0_14, %c256] : memref<1x272xf32, #tpu.memory_space<vmem>>, vector<1x16xf32>
    %18 = vector.broadcast %17 : vector<1x16xf32> to vector<8x16xf32>
    %19 = arith.addf %16, %18 : vector<8x16xf32>
    %20 = arith.negf %19 : vector<8x16xf32>
    %21 = math.exp %20 : vector<8x16xf32>
    %cst_15 = arith.constant 1.000000e+00 : f32
    %22 = vector.broadcast %cst_15 : f32 to vector<8x16xf32>
    %23 = arith.addf %22, %21 : vector<8x16xf32>
    %24 = arith.divf %22, %23 : vector<8x16xf32>
    %c0_16 = arith.constant 0 : index
    %c0_17 = arith.constant 0 : index
    %25 = vector.load %arg6[%c0_16, %c0_17] : memref<8x16xf32, #tpu.memory_space<vmem>>, vector<8x16xf32>
    tpu.vector_store %arg6[%c0_16, %c0_17], %24 {strides = array<i32>} : memref<8x16xf32, #tpu.memory_space<vmem>>, vector<8x16xf32>,
    return
  }
  func.func @transform_0(%arg0: i32) -> (i32, i32) {
    %c0_i32 = arith.constant 0 : i32
    %c0_i32_0 = arith.constant 0 : i32
    return %arg0, %c0_i32 : i32, i32
  }
  func.func @transform_1(%arg0: i32) -> (i32, i32) {
    %c0_i32 = arith.constant 0 : i32
    %c0_i32_0 = arith.constant 0 : i32
    %c0_i32_1 = arith.constant 0 : i32
    return %c0_i32, %c0_i32_0 : i32, i32
  }
  func.func @transform_2(%arg0: i32) -> (i32, i32) {
    %c0_i32 = arith.constant 0 : i32
    %c0_i32_0 = arith.constant 0 : i32
    %c0_i32_1 = arith.constant 0 : i32
    return %c0_i32, %c0_i32_0 : i32, i32
  }
  func.func @transform_3(%arg0: i32) -> (i32, i32) {
    %c0_i32 = arith.constant 0 : i32
    %c0_i32_0 = arith.constant 0 : i32
    %c0_i32_1 = arith.constant 0 : i32
    return %c0_i32, %c0_i32_0 : i32, i32
  }
  func.func @transform_4(%arg0: i32) -> (i32, i32) {
    %c0_i32 = arith.constant 0 : i32
    %c0_i32_0 = arith.constant 0 : i32
    %c0_i32_1 = arith.constant 0 : i32
    return %c0_i32, %c0_i32_0 : i32, i32
  }
  func.func @transform_5(%arg0: i32) -> (i32, i32) {
    %c0_i32 = arith.constant 0 : i32
    %c0_i32_0 = arith.constant 0 : i32
    return %arg0, %c0_i32 : i32, i32
  }
}

</mosaic_0001>

<bundles_post_ra>
// kernel: tpu_custom_call.1
= control target key start
LH: loop header
LB: loop body
LE: loop exit
PB: predicated region body
PF: predicated region fallthrough
CT: control target
= control target key end

     0   :  { %10 = vsyncpa [#allocation3], 0  ;;  %s760_s0 = inlined_call_operand.vmem [shape: f32[8,32], index: 0, kind: input, shape index: {}]   ;;  %s761_s1 = inlined_call_operand.hbm [shape: f32[32,128], index: 1, kind: input, shape index: {}]   ;;  %s762_s2 = inlined_call_operand.vmem [shape: f32[128,128], index: 2, kind: input, shape index: {}]   ;;  %s763_s3 = inlined_call_operand.vmem [shape: f32[128,16], index: 3, kind: input, shape index: {}]   ;;  %s764_s4 = inlined_call_operand.vmem [shape: f32[1,272], index: 4, kind: input, shape index: {}]   ;;  %s765_s5 = inlined_call_operand.hbm [shape: f32[8,16], index: 5, kind: output, shape index: {}]  }
   0x1   :  { %11 = vsyncpa [#allocation4], 0  ;;  %s570_s18 = smov [#allocation2]   ;;  %s522_s22 = scalar_lea.hbm %s761_s1, 512 }
   0x2   :  { %s19_s19 = sshll.u32 %s570_s18, 4  ;;  %p523_p0 = scmp.ne.s32.totalorder %s761_s1, %s522_s22  ;;  %s20_s19 = int_to_ptr.vmem [resolvable:$true] %s19_s19 }
   0x3   :  { %p526_p1 = scmp.lt.u32.totalorder %s522_s22, %s761_s1 }
   0x5   :  { %p528_p2 = pnand %p526_p1, %p523_p0 }
   0x7   :  { %531 = shalt.err (!%p528_p2)
}
   0x8   :  { %s532_s27 = scalar_lea.vmem %s20_s19, 512  ;;  %p537_p4 = scmp.lt.s32.totalorder %s20_s19, %s20_s19 }
   0x9   :  { %p533_p3 = scmp.ne.s32.totalorder %s20_s19, %s532_s27  ;;  %p538_p5 = scmp.lt.s32.totalorder %s532_s27, %s532_s27 }
   0xb   :  { %p539_p6 = por %p538_p5, %p537_p4 }
   0xd   :  { %p540_p7 = pnand %p539_p6, %p533_p3 }
   0xf   :  { %543 = shalt.err (!%p540_p7)
}
  0x10   :  { %s571_s28 = smov 128   ;;  %s572_s29 = smov 8  }
  0x11   :  { %25 = dma.hbm_to_vmem [thread:$0]  %s761_s1, 512, %s20_s19, [#allocation3], %s571_s28, %s571_s28, %s572_s29  }
  0x12   :  { %566 = dma.done.wait [#allocation3], 512  }
  0x13   :  { %567 = vsyncadd [#allocation3], 4294966784  ;;  %v573_v0 = vmov 0.0|0.0   ;;  %vm574_vm0 = vmmov 0   ;;  %v575_v1 = vmov 0.0   ;;  %v36_v2 = vld [vmem:[#allocation2] sm:$0xff] }
  0x14   :  { %457 = vmatprep.subr.bf16.mxu0 %v573_v0  ;;  %384 = vmatprep.mubr.msk.f32.mxu0 %vm574_vm0, %v575_v1  ;;  %v37_v3 = vld [vmem:[#allocation2 + $0x8] sm:$0xff]  ;;  %v38_v4 = vld [vmem:[#allocation2 + $0x10] sm:$0xff]  ;;  %v39_v6 = vld [vmem:[#allocation2 + $0x18] sm:$0xff]  ;;  %vm47_vm1 = vcmask 261120   ;;  %vm315_vm2 = vcmask 130048  }
  0x15   :  { %463 = vmatprep.subr.bf16.mxu1 %v573_v0  ;;  %419 = vmatprep.mubr.msk.f32.mxu1 %vm574_vm0, %v575_v1  ;;  %v458_v5 = vpack.c.bf16 %v37_v3, %v36_v2  ;;  %v122_v7 = vld [vmem:[%s762_s2] sm:$0xff]  ;;  %v123_v8 = vld [vmem:[%s762_s2 + $0x8] sm:$0xff]  ;;  %v124_v9 = vld [vmem:[%s762_s2 + $0x10] sm:$0xff]  ;;  %v461_v11 = vpack.c.bf16 %v39_v6, %v38_v4 }
  0x16   :  { %v125_v10 = vld [vmem:[%s762_s2 + $0x18] sm:$0xff]  ;;  %v464_v12 = vpack.c.bf16 %v123_v8, %v122_v7  ;;  %v126_v14 = vld [vmem:[%s762_s2 + $0x20] sm:$0xff]  ;;  %v127_v15 = vld [vmem:[%s762_s2 + $0x28] sm:$0xff] }
  0x17   :  { %459 = vmatpush3.bf16.msra.mxu0 %v458_v5  ;;  %v467_v13 = vpack.c.bf16 %v125_v10, %v124_v9  ;;  %v35_v16 = vld [vmem:[%s760_s0] sm:$0xff]  ;;  %v470_v17 = vpack.c.bf16 %v127_v15, %v126_v14  ;;  %v128_v18 = vld [vmem:[%s762_s2 + $0x30] sm:$0xff]  ;;  %v129_v19 = vld [vmem:[%s762_s2 + $0x38] sm:$0xff] }
  0x18   :  { %460 = vmatprep.subr.bf16.mxu0 %v573_v0  ;;  %465 = vmatpush3.bf16.msra.mxu1 %v464_v12  ;;  %v473_v20 = vpack.c.bf16 %v129_v19, %v128_v18  ;;  %v130_v21 = vld [vmem:[%s762_s2 + $0x40] sm:$0xff]  ;;  %v131_v22 = vld [vmem:[%s762_s2 + $0x48] sm:$0xff]  ;;  %v132_v24 = vld [vmem:[%s762_s2 + $0x50] sm:$0xff] }
  0x19   :  { %466 = vmatprep.subr.bf16.mxu1 %v573_v0  ;;  %v476_v23 = vpack.c.bf16 %v131_v22, %v130_v21  ;;  %v133_v25 = vld [vmem:[%s762_s2 + $0x58] sm:$0xff]  ;;  %v134_v27 = vld [vmem:[%s762_s2 + $0x60] sm:$0xff]  ;;  %v135_v28 = vld [vmem:[%s762_s2 + $0x68] sm:$0xff] }
  0x1a   :  { %v479_v26 = vpack.c.bf16 %v133_v25, %v132_v24  ;;  %v482_v29 = vpack.c.bf16 %v135_v28, %v134_v27  ;;  %v136_v30 = vld [vmem:[%s762_s2 + $0x70] sm:$0xff]  ;;  %v137_v31 = vld [vmem:[%s762_s2 + $0x78] sm:$0xff]  ;;  %v216_v33 = vld [vmem:[%s763_s3] sm:$0xff] }
  0x1b   :  { %462 = vmatpush3.bf16.msra.mxu0 %v461_v11  ;;  %v485_v32 = vpack.c.bf16 %v137_v31, %v136_v30  ;;  %v217_v34 = vld [vmem:[%s763_s3 + $0x8] sm:$0xff]  ;;  %v218_v35 = vld [vmem:[%s763_s3 + $0x10] sm:$0xff]  ;;  %v219_v37 = vld [vmem:[%s763_s3 + $0x18] sm:$0xff] }
  0x1c   :  { %487 = vmatprep.subr.bf16.mxu0 %v573_v0  ;;  %468 = vmatpush3.bf16.msra.mxu1 %v467_v13  ;;  %v488_v36 = vpack.c.bf16 %v217_v34, %v216_v33  ;;  %v491_v38 = vpack.c.bf16 %v219_v37, %v218_v35  ;;  %v220_v39 = vld [vmem:[%s763_s3 + $0x20] sm:$0xff]  ;;  %v221_v40 = vld [vmem:[%s763_s3 + $0x28] sm:$0xff]  ;;  %v222_v42 = vld [vmem:[%s763_s3 + $0x30] sm:$0xff] }
  0x1d   :  { %469 = vmatprep.subr.bf16.mxu1 %v573_v0  ;;  %v494_v41 = vpack.c.bf16 %v221_v40, %v220_v39  ;;  %v223_v43 = vld [vmem:[%s763_s3 + $0x38] sm:$0xff]  ;;  %v224_v45 = vld [vmem:[%s763_s3 + $0x40] sm:$0xff]  ;;  %v225_v46 = vld [vmem:[%s763_s3 + $0x48] sm:$0xff] }
  0x1e   :  { %385 = vmatmul.mubr.msk.f32.vlgmr.msra.gmra.mrb[0].mxu0 %vm47_vm1, %v35_v16  ;;  %v497_v44 = vpack.c.bf16 %v223_v43, %v222_v42  ;;  %v500_v47 = vpack.c.bf16 %v225_v46, %v224_v45  ;;  %v226_v48 = vld [vmem:[%s763_s3 + $0x50] sm:$0xff]  ;;  %v227_v49 = vld [vmem:[%s763_s3 + $0x58] sm:$0xff]  ;;  %v228_v51 = vld [vmem:[%s763_s3 + $0x60] sm:$0xff] }
  0x1f   :  { %454 = vmatprep.mubr.msk.f32.mxu0 %vm574_vm0, %v575_v1  ;;  %489 = vmatpush3.bf16.msra.mxu0 %v488_v36  ;;  %v503_v50 = vpack.c.bf16 %v227_v49, %v226_v48  ;;  %v229_v52 = vld [vmem:[%s763_s3 + $0x68] sm:$0xff]  ;;  %v332_v54 = vld [vmem:[%s764_s4] ss:$0 sm:$0xff]  ;;  %v230_v59 = vld [vmem:[%s763_s3 + $0x70] sm:$0xff] }
  0x20   :  { %471 = vmatpush3.bf16.msra.mxu1 %v470_v17  ;;  %490 = vmatprep.subr.bf16.mxu0 %v573_v0  ;;  %v506_v53 = vpack.c.bf16 %v229_v52, %v228_v51  ;;  %v231_v60 = vld [vmem:[%s763_s3 + $0x78] sm:$0xff]  ;;  %v334_v62 = vld [vmem:[%s764_s4 + $0x1] ss:$0 sm:$0xff]  ;;  %v335_v3 = vld [vmem:[%s764_s4 + $0x2] ss:$0 sm:$0xff]  ;;  %s576_s3 = smov [#allocation5]  }
  0x21   :  { %472 = vmatprep.subr.bf16.mxu1 %v573_v0  ;;  %v509_v61 = vpack.c.bf16 %v231_v60, %v230_v59  ;;  %s323_s22 = sshll.u32 %s576_s3, 4  ;;  %s324_s22 = int_to_ptr.vmem [resolvable:$true] %s323_s22 }
  0x22   :  { %s544_s23 = scalar_lea.vmem %s324_s22, 128  ;;  %p549_p9 = scmp.lt.s32.totalorder %s324_s22, %s324_s22 }
  0x23   :  { %492 = vmatpush3.bf16.msra.mxu0 %v491_v38  ;;  %p545_p8 = scmp.ne.s32.totalorder %s324_s22, %s544_s23  ;;  %p550_p10 = scmp.lt.s32.totalorder %s544_s23, %s544_s23 }
  0x24   :  { %474 = vmatpush3.bf16.msra.mxu1 %v473_v20  ;;  %493 = vmatprep.subr.bf16.mxu0 %v573_v0 }
  0x25   :  { %475 = vmatprep.subr.bf16.mxu1 %v573_v0  ;;  %p551_p11 = por %p550_p10, %p549_p9 }
  0x27   :  { %495 = vmatpush3.bf16.msra.mxu0 %v494_v41  ;;  %p552_p12 = pnand %p551_p11, %p545_p8 }
  0x28   :  { %477 = vmatpush3.bf16.msra.mxu1 %v476_v23  ;;  %496 = vmatprep.subr.bf16.mxu0 %v573_v0 }
  0x29   :  { %478 = vmatprep.subr.bf16.mxu1 %v573_v0 }
  0x2b   :  { %498 = vmatpush3.bf16.msra.mxu0 %v497_v44 }
  0x2c   :  { %480 = vmatpush3.bf16.msra.mxu1 %v479_v26  ;;  %499 = vmatprep.subr.bf16.mxu0 %v573_v0 }
  0x2d   :  { %481 = vmatprep.subr.bf16.mxu1 %v573_v0 }
  0x2f   :  { %501 = vmatpush3.bf16.msra.mxu0 %v500_v47 }
  0x30   :  { %483 = vmatpush3.bf16.msra.mxu1 %v482_v29  ;;  %502 = vmatprep.subr.bf16.mxu0 %v573_v0 }
  0x31   :  { %484 = vmatprep.subr.bf16.mxu1 %v573_v0 }
  0x33   :  { %504 = vmatpush3.bf16.msra.mxu0 %v503_v50 }
  0x34   :  { %486 = vmatpush3.bf16.msra.mxu1 %v485_v32  ;;  %505 = vmatprep.subr.bf16.mxu0 %v573_v0 }
  0x37   :  { %507 = vmatpush3.bf16.msra.mxu0 %v506_v53 }
  0x38   :  { %508 = vmatprep.subr.bf16.mxu0 %v573_v0 }
  0x3b   :  { %510 = vmatpush3.bf16.msra.mxu0 %v509_v61 }
  0xf1   :  { %v117_v55 = vpop.f32.mrb[0].mxu0 }
  0xf2   :  { %v118_v56 = vadd.f32 %v332_v54, %v117_v55  ;;  %v386_v57 = vpop.f32.mrb[1].mxu0 }
  0xf4   :  { %v121_v58 = vmax.f32 %v118_v56, 0.0 }
  0xf6   :  { %420 = vmatmul.mubr.f32.vlgmr.msra.gmra.mrb[0].mxu1 %v121_v58 }
 0x1c9   :  { %v211_v63 = vpop.f32.mrb[0].mxu1 }
 0x1ca   :  { %v212_v0 = vadd.f32 %v334_v62, %v211_v63  ;;  %v421_v1 = vpop.f32.mrb[1].mxu1 }
 0x1cc   :  { %v215_v2 = vmax.f32 %v212_v0, 0.0 }
 0x1ce   :  { %455 = vmatmul.mubr.f32.vlgmr.msra.gmra.mrb[2].mxu0 %v215_v2 }
 0x2a1   :  { %v305_v4 = vpop.f32.mrb[2].mxu0 }
 0x2a2   :  { %v306_v5 = vadd.f32 %v335_v3, %v305_v4  ;;  %v456_v6 = vpop.f32.mrb[3].mxu0 }
 0x2a4   :  { %v336_v7 = vmul.f32 -1.442695, %v306_v5 }
 0x2a6   :  { %518 = vpow2.f32 %v336_v7 }
 0x2b0   :  { %v519_v8 = vpop.eup %518 }
 0x2b1   :  { %v312_v9 = vadd.f32 1.0, %v519_v8 }
 0x2b3   :  { %520 = vrcp.f32 %v312_v9 }
 0x2bd   :  { %v521_v10 = vpop.eup %520 }
 0x2be   :  { %316 = vst.msk [vmem:[#allocation5] sm:$0xff] %vm315_vm2, %v521_v10 }
 0x2bf   :  { %555 = shalt.err (!%p552_p12)
}
 0x2c0   :  { %s556_s24 = scalar_lea.hbm %s765_s5, 128 }
 0x2c1   :  { %p557_p13 = scmp.ne.s32.totalorder %s765_s5, %s556_s24  ;;  %p560_p0 = scmp.lt.u32.totalorder %s556_s24, %s765_s5 }
 0x2c3   :  { %p562_p1 = pnand %p560_p0, %p557_p13 }
 0x2c5   :  { %565 = shalt.err (!%p562_p1)
}
 0x2c6   :  { %326 = dma.vmem_to_hbm [thread:$0]  %s324_s22, 128, %s765_s5, [#allocation4]  }
 0x2c7   :  { %568 = dma.done.wait [#allocation4], 128  }
 0x2c8   :  { %569 = vsyncadd [#allocation4], 4294967168 }
 0x2c9   :  { %330 = vsyncpa [#allocation3], 1 }
 0x2ca   :  { %331 = vsyncpa [#allocation4], 1 }

</bundles_post_ra>
